<compile_context>
chip_gen: v5e
topology: v5e:2x2
jax: 0.10.0
libtpu: 0.0.40
codegen_flags: <defaults>
</compile_context>

<pallas_src>
import functools

import jax
import jax.numpy as jnp
import numpy as np
from jax.experimental import pallas as pl
from jax.experimental.pallas import tpu as pltpu


# ----------------------------------------------------------------------------
# Pallas kernel: one (block_b, block_s) token tile per grid step.
# ----------------------------------------------------------------------------
def _bert_embedding_kernel(ids_smem,          # (B, S) int32, SMEM (scalar prefetch)
                           types_ref,         # (bt, st) f32, VMEM (0./1. type ids)
                           tok_hbm,           # (V, H) table ref in HBM (ANY)
                           pos_t0_ref,        # (st, H) f32, VMEM (pos + type0 row)
                           tdelta_ref,        # (1, H) f32, VMEM  (type1 - type0)
                           gamma_ref,         # (1, H) f32, VMEM
                           beta_ref,          # (1, H) f32, VMEM
                           out_ref,           # (bt, st, H) out dtype, VMEM
                           gather_buf,        # (bt*st, H) table dtype, VMEM scratch
                           sem,               # (1,) DMA semaphore
                           *, eps, bt, st):
    H = out_ref.shape[-1]
    n_tok = bt * st
    vmax = tok_hbm.shape[0] - 1                 # hoisted clamp bound (static)
    b_base = pl.program_id(0) * bt              # hoisted global offsets
    s_base = pl.program_id(1) * st

    # --- 1) Token gather: issue ALL bt*st row DMAs (HBM table -> VMEM scratch)
    #        before any wait.  gather_buf holds every row, so there is no need
    #        for backpressure; a full queue keeps the HBM pipe busy and lets
    #        step 2 overlap the entire gather.  No div/mod in the hot loop.
    @pl.loop(0, bt)
    def _issue_rows(b):
        gb = b_base + b
        row_base = b * st

        @pl.loop(0, st)
        def _issue_cols(s):
            # Clamp malformed ids instead of issuing an out-of-bounds DMA.
            tok_id = jnp.clip(ids_smem[gb, s_base + s], 0, vmax)
            pltpu.make_async_copy(tok_hbm.at[pl.ds(tok_id, 1), :],
                                  gather_buf.at[pl.ds(row_base + s, 1), :],
                                  sem.at[0]).start()

    # --- 2) Token-independent work overlaps the in-flight gather DMAs:
    #        the 2-row type embedding is folded to a single FMA against the
    #        precomputed (pos + type0) rows and (type1 - type0) delta.
    type_pos = (pos_t0_ref[...][None, :, :]
                + types_ref[...][:, :, None] * tdelta_ref[...].reshape(1, 1, H))

    # --- 3) Drain: one wait per destination row.  Each wait names the real
    #        dst slice so the compiler sees a dependency on every row of
    #        gather_buf before it is read below.
    @pl.loop(0, n_tok)
    def _drain(i):
        pltpu.make_async_copy(tok_hbm.at[pl.ds(0, 1), :],
                              gather_buf.at[pl.ds(i, 1), :],
                              sem.at[0]).wait()

    # --- 4) Sum + LayerNorm over the hidden axis (two-pass mean/variance,
    #        f32 accumulation; same op count as the single-pass form).
    x = gather_buf[...].astype(jnp.float32).reshape(bt, st, H) + type_pos
    h_inv = 1.0 / H
    mean = jnp.sum(x, axis=-1, keepdims=True) * h_inv
    xc = x - mean
    var = jnp.sum(xc * xc, axis=-1, keepdims=True) * h_inv
    y = xc * jax.lax.rsqrt(var + eps)
    y = y * gamma_ref[...].reshape(1, 1, H) + beta_ref[...].reshape(1, 1, H)

    # TODO(synk): dropout is identity (eval mode); training dropout would mask
    # here using pltpu.prng_seed + pltpu.prng_random_bits.
    out_ref[...] = y.astype(out_ref.dtype)


# ----------------------------------------------------------------------------
# Tile selection.  Block-shape rules for the (bt, st[, H]) blocks:
#   * seq tile: multiple of 128, or the full S
#   * batch tile: multiple of 8, or the full B
# and, when divisibility allows, force >=2 grid steps so the "parallel" axes
# can shard across both TensorCores on megacore parts (v7x).
# ----------------------------------------------------------------------------
def _default_tile_budget():
    # 128 MiB-VMEM parts (v5e/v6e): bigger tiles amortize the ~0.35 us/step
    # grid overhead.  64 MiB-VMEM parts (v7x) and unknown: stay conservative.
    try:
        kind = jax.devices()[0].device_kind.lower()
    except Exception:
        return 2 * 1024 * 1024
    if ("v5 lite" in kind) or ("v5e" in kind) or ("v6" in kind):
        return 4 * 1024 * 1024
    return 2 * 1024 * 1024


def _choose_tiles(B, S, H, itemsize=4, target_tile_bytes=None):
    if target_tile_bytes is None:
        target_tile_bytes = _default_tile_budget()
    st = 128 if S % 128 == 0 else S
    bt = B
    # Grow the sequence tile while it stays within budget and divides S.
    while (st * 2 <= S and S % (st * 2) == 0 and st % 128 == 0
           and bt * (st * 2) * H * itemsize <= target_tile_bytes):
        st *= 2
    # Shrink the batch tile to fit the budget (keep it a multiple of 8 or == B).
    while bt * st * H * itemsize > target_tile_bytes and bt % 16 == 0:
        bt //= 2
    # Guarantee >=2 grid steps when divisibility allows (v7x: 2 TensorCores).
    if (B // bt) * (S // st) < 2:
        if st % 256 == 0:
            st //= 2
        elif bt % 16 == 0:
            bt //= 2
    return bt, st


# ----------------------------------------------------------------------------
# Wrapper
# ----------------------------------------------------------------------------
def bert_embedding_forward(sentences, sentence_type, params, *, eps=1e-12,
                           out_dtype=jnp.float32, block_b=None, block_s=None,
                           target_tile_bytes=None):
    sentences = sentences.astype(jnp.int32)
    B, S = sentences.shape

    tok_tab = params["token_embedding"]
    V, H = tok_tab.shape
    type_tab = params["type_embedding"].astype(jnp.float32)
    pos = params["positional_embedding"][:S].astype(jnp.float32)       # (S, H)

    # Fold the 2-row type embedding into the positional rows:
    #   pos_plus_t0 (S, H)  and  type_delta (1, H)  ->  one FMA in the kernel.
    pos_t0 = pos + type_tab[0][None, :]
    tdelta = (type_tab[1] - type_tab[0]).reshape(1, H)

    gamma = params["gamma"].reshape(1, H).astype(jnp.float32)
    beta = params["beta"].reshape(1, H).astype(jnp.float32)

    if sentence_type is None:
        types_f = jnp.zeros((B, S), jnp.float32)
    else:
        types_f = sentence_type.astype(jnp.float32)

    bt, st = _choose_tiles(B, S, H, target_tile_bytes=target_tile_bytes)
    if block_b is not None:
        bt = block_b
    if block_s is not None:
        st = block_s
    assert B % bt == 0 and (bt == B or bt % 8 == 0), (B, bt)
    assert S % st == 0 and (st == S or st % 128 == 0), (S, st)

    n_tok = bt * st
    grid = (B // bt, S // st)
    kernel = functools.partial(_bert_embedding_kernel, eps=eps, bt=bt, st=st)

    tile_f32 = n_tok * H * 4
    out_bytes = n_tok * H * np.dtype(out_dtype).itemsize
    gather_bytes = n_tok * H * np.dtype(tok_tab.dtype).itemsize
    vmem_limit = (2 * out_bytes                  # double-buffered output
                  + gather_bytes                 # gather scratch
                  + 5 * tile_f32                 # live f32 temporaries
                  + 2 * st * H * 4               # positional rows (2x)
                  + 2 * n_tok * 4                # type-id tile (2x)
                  + 16 * H * 4                   # delta, gamma, beta
                  + 4 * 1024 * 1024)             # headroom
    # Clamp to 48 MiB so v7x (64 MiB physical VMEM/TC) keeps Mosaic headroom.
    vmem_limit = int(max(16 * 1024 * 1024, min(48 * 1024 * 1024, vmem_limit)))

    return pl.pallas_call(
        kernel,
        out_shape=jax.ShapeDtypeStruct((B, S, H), out_dtype),
        grid_spec=pltpu.PrefetchScalarGridSpec(
            num_scalar_prefetch=1,                               # token ids -> SMEM
            grid=grid,
            in_specs=[
                pl.BlockSpec((bt, st), lambda bi, si, ids: (bi, si)),   # type ids (f32)
                pl.BlockSpec(memory_space=pl.ANY),                      # token table (HBM)
                pl.BlockSpec((st, H), lambda bi, si, ids: (si, 0)),     # pos + type0 rows
                pl.BlockSpec((1, H), lambda bi, si, ids: (0, 0)),       # type delta
                pl.BlockSpec((1, H), lambda bi, si, ids: (0, 0)),       # gamma
                pl.BlockSpec((1, H), lambda bi, si, ids: (0, 0)),       # beta
            ],
            out_specs=pl.BlockSpec((bt, st, H), lambda bi, si, ids: (bi, si, 0)),
            scratch_shapes=[
                pltpu.VMEM((n_tok, H), tok_tab.dtype),                  # gathered rows
                pltpu.SemaphoreType.DMA((1,)),
            ],
        ),
        compiler_params=pltpu.CompilerParams(
            dimension_semantics=("parallel", "parallel"),
            vmem_limit_bytes=vmem_limit,
        ),
    )(sentences, types_f, tok_tab, pos_t0, tdelta, gamma, beta)


# ----------------------------------------------------------------------------
# Deterministic parameter construction (mirrors BERTEmbedding.__init__)
# ----------------------------------------------------------------------------
def make_params(config, key):
    V = config["vocab_size"]
    H = config["hidden_size"]
    L = config["max_sentence_length"]

    k_tok, k_type, k_g, k_b = jax.random.split(key, 4)
    tok_tab = 0.02 * jax.random.normal(k_tok, (V, H), jnp.float32)
    tok_tab = tok_tab.at[0].set(0.0)  # padding_idx=0 row is zero
    type_tab = 0.02 * jax.random.normal(k_type, (2, H), jnp.float32)

    # Sinusoidal positional embedding (positional_learnt = False).
    pos = np.zeros((L, H), dtype=np.float32)
    numerator = np.arange(L, dtype=np.float32).reshape(-1, 1)
    inv_denominator = np.exp(
        -np.arange(0, H, 2, dtype=np.float32) * np.log(10000.0) / H)
    pos[:, 0::2] = np.sin(numerator * inv_denominator)
    pos[:, 1::2] = np.cos(numerator * inv_denominator)

    # gamma/beta lightly perturbed from (1, 0) so the affine path is exercised.
    gamma = 1.0 + 0.1 * jax.random.normal(k_g, (H,), jnp.float32)
    beta = 0.1 * jax.random.normal(k_b, (H,), jnp.float32)

    return {
        "token_embedding": tok_tab,
        "type_embedding": type_tab,
        "positional_embedding": jnp.asarray(pos),
        "gamma": gamma,
        "beta": beta,
    }


# Pure-JAX reference for a sanity check.
def reference_forward(sentences, sentence_type, params, *, eps=1e-12):
    S = sentences.shape[1]
    tok = params["token_embedding"][sentences]
    typ = params["type_embedding"][sentence_type]
    pos = params["positional_embedding"][:S][None, :, :]
    x = tok + typ + pos
    mean = jnp.mean(x, axis=-1, keepdims=True)
    var = jnp.mean((x - mean) ** 2, axis=-1, keepdims=True)
    xn = (x - mean) / jnp.sqrt(var + eps)
    return xn * params["gamma"] + params["beta"]


if __name__ == "__main__":
    key = jax.random.PRNGKey(0)

    # ---- Config 1: small shapes, single-tile grid (1, 1). ----
    cfg1 = {"vocab_size": 32, "hidden_size": 128, "max_sentence_length": 32,
            "dropout_rate": 0.1, "positional_learnt": False}
    k_params, k_ids, k_typ, key = jax.random.split(key, 4)
    params1 = make_params(cfg1, k_params)
    B, S = 2, 16
    sent1 = jax.random.randint(k_ids, (B, S), 0, cfg1["vocab_size"], dtype=jnp.int32)
    styp1 = jax.random.randint(k_typ, (B, S), 0, 2, dtype=jnp.int32)

    out1 = jax.block_until_ready(bert_embedding_forward(sent1, styp1, params1))
    ref1 = reference_forward(sent1, styp1, params1)
    np.testing.assert_allclose(np.asarray(out1), np.asarray(ref1),
                               rtol=1e-4, atol=1e-4)

    # ---- Config 2: longer sequence -> (1, 2) grid (two parallel steps). ----
    cfg2 = {"vocab_size": 64, "hidden_size": 128, "max_sentence_length": 256,
            "dropout_rate": 0.1, "positional_learnt": False}
    k_params, k_ids, k_typ, key = jax.random.split(key, 4)
    params2 = make_params(cfg2, k_params)
    B, S = 2, 256
    sent2 = jax.random.randint(k_ids, (B, S), 0, cfg2["vocab_size"], dtype=jnp.int32)
    styp2 = jax.random.randint(k_typ, (B, S), 0, 2, dtype=jnp.int32)

    out2 = jax.block_until_ready(bert_embedding_forward(sent2, styp2, params2))
    ref2 = reference_forward(sent2, styp2, params2)
    np.testing.assert_allclose(np.asarray(out2), np.asarray(ref2),
                               rtol=1e-4, atol=1e-4)

    # ---- bf16 output writeback path (halves HBM write bytes; v5e lever). ----
    out2_bf = jax.block_until_ready(
        bert_embedding_forward(sent2, styp2, params2, out_dtype=jnp.bfloat16))
    np.testing.assert_allclose(np.asarray(out2_bf.astype(jnp.float32)),
                               np.asarray(ref2), rtol=2e-2, atol=2e-2)

    # ---- sentence_type=None path (module default: all-zero type ids). ----
    out3 = jax.block_until_ready(bert_embedding_forward(sent1, None, params1))
    ref3 = reference_forward(sent1, jnp.zeros_like(sent1), params1)
    np.testing.assert_allclose(np.asarray(out3), np.asarray(ref3),
                               rtol=1e-4, atol=1e-4)

    print("KERNEL_OK")
</pallas_src>

<mosaic_0001>
module attributes {stable_mosaic.version = 11 : i64} {
  func.func @_bert_embedding_kernel(%arg0: i32, %arg1: i32, %arg2: memref<2x16xi32, #tpu.memory_space<smem>>, %arg3: memref<2x16xf32, #tpu.memory_space<vmem>>, %arg4: memref<32x128xf32, #tpu.memory_space<any>>, %arg5: memref<16x128xf32, #tpu.memory_space<vmem>>, %arg6: memref<1x128xf32, #tpu.memory_space<vmem>>, %arg7: memref<1x128xf32, #tpu.memory_space<vmem>>, %arg8: memref<1x128xf32, #tpu.memory_space<vmem>>, %arg9: memref<2x16x128xf32, #tpu.memory_space<vmem>>, %arg10: memref<32x128xf32, #tpu.memory_space<vmem>>, %arg11: memref<1x!tpu.dma_semaphore, #tpu.memory_space<semaphore_mem>>) attributes {dimension_semantics = [#tpu.dimension_semantics<parallel>, #tpu.dimension_semantics<parallel>], iteration_bounds = array<i64: 1, 1>, scalar_prefetch = 1 : i64, scratch_operands = 2 : i64, tpu.core_type = #tpu.core_type<tc>, window_params = [{transform_indices = @transform_0, window_bounds = array<i64: 2, 16>}, {}, {transform_indices = @transform_2, window_bounds = array<i64: 16, 128>}, {pipeline_mode = #tpu.pipeline_mode<synchronous>, transform_indices = @transform_3, window_bounds = array<i64: 1, 128>}, {pipeline_mode = #tpu.pipeline_mode<synchronous>, transform_indices = @transform_4, window_bounds = array<i64: 1, 128>}, {pipeline_mode = #tpu.pipeline_mode<synchronous>, transform_indices = @transform_5, window_bounds = array<i64: 1, 128>}, {transform_indices = @transform_6, window_bounds = array<i64: 2, 16, 128>}]} {
    %c2_i32 = arith.constant 2 : i32
    %0 = arith.muli %arg0, %c2_i32 : i32
    %c16_i32 = arith.constant 16 : i32
    %1 = arith.muli %arg1, %c16_i32 : i32
    %c0_i32 = arith.constant 0 : i32
    %c2_i32_0 = arith.constant 2 : i32
    %2 = arith.addi %c0_i32, %c2_i32_0 : i32
    %c1_i32 = arith.constant 1 : i32
    scf.for %arg12 = %c0_i32 to %2 step %c1_i32  : i32 {
      %c1_i32_23 = arith.constant 1 : i32
      %43 = arith.muli %arg12, %c1_i32_23 : i32
      %c0_i32_24 = arith.constant 0 : i32
      %44 = arith.addi %c0_i32_24, %43 : i32
      %45 = arith.addi %0, %44 : i32
      %c16_i32_25 = arith.constant 16 : i32
      %46 = arith.muli %44, %c16_i32_25 : i32
      %c0_i32_26 = arith.constant 0 : i32
      %c16_i32_27 = arith.constant 16 : i32
      %47 = arith.addi %c0_i32_26, %c16_i32_27 : i32
      %c1_i32_28 = arith.constant 1 : i32
      scf.for %arg13 = %c0_i32_26 to %47 step %c1_i32_28  : i32 {
        %c1_i32_30 = arith.constant 1 : i32
        %48 = arith.muli %arg13, %c1_i32_30 : i32
        %c0_i32_31 = arith.constant 0 : i32
        %49 = arith.addi %c0_i32_31, %48 : i32
        %50 = arith.addi %1, %49 : i32
        %51 = arith.index_cast %45 : i32 to index
        %52 = arith.index_cast %50 : i32 to index
        %53 = memref.load %arg2[%51, %52] : memref<2x16xi32, #tpu.memory_space<smem>>
        %c0_i32_32 = arith.constant 0 : i32
        %c31_i32 = arith.constant 31 : i32
        %54 = arith.maxsi %c0_i32_32, %53 : i32
        %55 = arith.minsi %c31_i32, %54 : i32
        %56 = arith.addi %46, %49 : i32
        %c0_i32_33 = arith.constant 0 : i32
        %c0_i32_34 = arith.constant 0 : i32
        %57 = tpu.memref_slice %arg4[%55, %c0_i32_34] : memref<32x128xf32, #tpu.memory_space<any>> -> memref<1x128xf32, #tpu.memory_space<any>>
        %c0_i32_35 = arith.constant 0 : i32
        %58 = tpu.memref_slice %arg10[%56, %c0_i32_35] : memref<32x128xf32, #tpu.memory_space<vmem>> -> memref<1x128xf32, #tpu.memory_space<vmem>>
        %59 = tpu.memref_slice %arg11[%c0_i32_33] : memref<1x!tpu.dma_semaphore, #tpu.memory_space<semaphore_mem>> -> memref<1x!tpu.dma_semaphore, #tpu.memory_space<semaphore_mem>>
        %60 = tpu.memref_squeeze %59 : memref<1x!tpu.dma_semaphore, #tpu.memory_space<semaphore_mem>> -> memref<!tpu.dma_semaphore, #tpu.memory_space<semaphore_mem>>
        tpu.enqueue_dma source(%57 : memref<1x128xf32, #tpu.memory_space<any>>) target(%58 : memref<1x128xf32, #tpu.memory_space<vmem>>) target_semaphore(%60 : memref<!tpu.dma_semaphore, #tpu.memory_space<semaphore_mem>>)
      }
      %c16_i32_29 = arith.constant 16 : i32
    }
    %c2_i32_1 = arith.constant 2 : i32
    %c0 = arith.constant 0 : index
    %c0_2 = arith.constant 0 : index
    %3 = vector.load %arg5[%c0, %c0_2] : memref<16x128xf32, #tpu.memory_space<vmem>>, vector<16x128xf32>
    %4 = vector.shape_cast %3 : vector<16x128xf32> to vector<1x16x128xf32>
    %c0_3 = arith.constant 0 : index
    %c0_4 = arith.constant 0 : index
    %5 = vector.load %arg3[%c0_3, %c0_4] : memref<2x16xf32, #tpu.memory_space<vmem>>, vector<2x16xf32>
    %6 = vector.shape_cast %5 : vector<2x16xf32> to vector<2x16x1xf32>
    %c0_5 = arith.constant 0 : index
    %c0_6 = arith.constant 0 : index
    %7 = vector.load %arg6[%c0_5, %c0_6] : memref<1x128xf32, #tpu.memory_space<vmem>>, vector<1x128xf32>
    %8 = vector.shape_cast %7 : vector<1x128xf32> to vector<1x1x128xf32>
    %9 = vector.broadcast %6 : vector<2x16x1xf32> to vector<2x16x128xf32>
    %10 = vector.broadcast %8 : vector<1x1x128xf32> to vector<2x16x128xf32>
    %11 = arith.mulf %9, %10 : vector<2x16x128xf32>
    %12 = vector.broadcast %4 : vector<1x16x128xf32> to vector<2x16x128xf32>
    %13 = arith.addf %12, %11 : vector<2x16x128xf32>
    %c0_i32_7 = arith.constant 0 : i32
    %c32_i32 = arith.constant 32 : i32
    %14 = arith.addi %c0_i32_7, %c32_i32 : i32
    %c1_i32_8 = arith.constant 1 : i32
    scf.for %arg12 = %c0_i32_7 to %14 step %c1_i32_8  : i32 {
      %c1_i32_23 = arith.constant 1 : i32
      %43 = arith.muli %arg12, %c1_i32_23 : i32
      %c0_i32_24 = arith.constant 0 : i32
      %44 = arith.addi %c0_i32_24, %43 : i32
      %c0_i32_25 = arith.constant 0 : i32
      %c0_i32_26 = arith.constant 0 : i32
      %c0_i32_27 = arith.constant 0 : i32
      %45 = tpu.memref_slice %arg4[%c0_i32_26, %c0_i32_27] : memref<32x128xf32, #tpu.memory_space<any>> -> memref<1x128xf32, #tpu.memory_space<any>>
      %c0_i32_28 = arith.constant 0 : i32
      %46 = tpu.memref_slice %arg10[%44, %c0_i32_28] : memref<32x128xf32, #tpu.memory_space<vmem>> -> memref<1x128xf32, #tpu.memory_space<vmem>>
      %47 = tpu.memref_slice %arg11[%c0_i32_25] : memref<1x!tpu.dma_semaphore, #tpu.memory_space<semaphore_mem>> -> memref<1x!tpu.dma_semaphore, #tpu.memory_space<semaphore_mem>>
      %48 = tpu.memref_squeeze %47 : memref<1x!tpu.dma_semaphore, #tpu.memory_space<semaphore_mem>> -> memref<!tpu.dma_semaphore, #tpu.memory_space<semaphore_mem>>
      tpu.wait_dma2 semaphore(%48 : memref<!tpu.dma_semaphore, #tpu.memory_space<semaphore_mem>>) src(%45 : memref<1x128xf32, #tpu.memory_space<any>>) dst(%46 : memref<1x128xf32, #tpu.memory_space<vmem>>)
    }
    %c32_i32_9 = arith.constant 32 : i32
    %c0_10 = arith.constant 0 : index
    %c0_11 = arith.constant 0 : index
    %15 = vector.load %arg10[%c0_10, %c0_11] : memref<32x128xf32, #tpu.memory_space<vmem>>, vector<32x128xf32>
    %16 = vector.shape_cast %15 : vector<32x128xf32> to vector<2x16x128xf32>
    %17 = arith.addf %16, %13 : vector<2x16x128xf32>
    %cst = arith.constant dense<0.000000e+00> : vector<2x16xf32>
    %18 = vector.multi_reduction <add>, %17, %cst [2] : vector<2x16x128xf32> to vector<2x16xf32>
    %19 = vector.shape_cast %18 : vector<2x16xf32> to vector<2x16x1xf32>
    %cst_12 = arith.constant 7.812500e-03 : f32
    %20 = vector.broadcast %cst_12 : f32 to vector<2x16x1xf32>
    %21 = arith.mulf %19, %20 : vector<2x16x1xf32>
    %22 = vector.broadcast %21 : vector<2x16x1xf32> to vector<2x16x128xf32>
    %23 = arith.subf %17, %22 : vector<2x16x128xf32>
    %24 = arith.mulf %23, %23 : vector<2x16x128xf32>
    %cst_13 = arith.constant dense<0.000000e+00> : vector<2x16xf32>
    %25 = vector.multi_reduction <add>, %24, %cst_13 [2] : vector<2x16x128xf32> to vector<2x16xf32>
    %26 = vector.shape_cast %25 : vector<2x16xf32> to vector<2x16x1xf32>
    %cst_14 = arith.constant 7.812500e-03 : f32
    %27 = vector.broadcast %cst_14 : f32 to vector<2x16x1xf32>
    %28 = arith.mulf %26, %27 : vector<2x16x1xf32>
    %cst_15 = arith.constant 9.99999996E-13 : f32
    %29 = vector.broadcast %cst_15 : f32 to vector<2x16x1xf32>
    %30 = arith.addf %28, %29 : vector<2x16x1xf32>
    %31 = math.rsqrt %30 : vector<2x16x1xf32>
    %32 = vector.broadcast %31 : vector<2x16x1xf32> to vector<2x16x128xf32>
    %33 = arith.mulf %23, %32 : vector<2x16x128xf32>
    %c0_16 = arith.constant 0 : index
    %c0_17 = arith.constant 0 : index
    %34 = vector.load %arg7[%c0_16, %c0_17] : memref<1x128xf32, #tpu.memory_space<vmem>>, vector<1x128xf32>
    %35 = vector.shape_cast %34 : vector<1x128xf32> to vector<1x1x128xf32>
    %36 = vector.broadcast %35 : vector<1x1x128xf32> to vector<2x16x128xf32>
    %37 = arith.mulf %33, %36 : vector<2x16x128xf32>
    %c0_18 = arith.constant 0 : index
    %c0_19 = arith.constant 0 : index
    %38 = vector.load %arg8[%c0_18, %c0_19] : memref<1x128xf32, #tpu.memory_space<vmem>>, vector<1x128xf32>
    %39 = vector.shape_cast %38 : vector<1x128xf32> to vector<1x1x128xf32>
    %40 = vector.broadcast %39 : vector<1x1x128xf32> to vector<2x16x128xf32>
    %41 = arith.addf %37, %40 : vector<2x16x128xf32>
    %c0_20 = arith.constant 0 : index
    %c0_21 = arith.constant 0 : index
    %c0_22 = arith.constant 0 : index
    %42 = vector.load %arg9[%c0_20, %c0_21, %c0_22] : memref<2x16x128xf32, #tpu.memory_space<vmem>>, vector<2x16x128xf32>
    tpu.vector_store %arg9[%c0_20, %c0_21, %c0_22], %41 {strides = array<i32>} : memref<2x16x128xf32, #tpu.memory_space<vmem>>, vector<2x16x128xf32>,
    return
  }
  func.func @transform_0(%arg0: i32, %arg1: i32, %arg2: memref<2x16xi32, #tpu.memory_space<smem>>) -> (i32, i32) {
    %c0_i32 = arith.constant 0 : i32
    return %arg0, %arg1 : i32, i32
  }
  func.func @transform_2(%arg0: i32, %arg1: i32, %arg2: memref<2x16xi32, #tpu.memory_space<smem>>) -> (i32, i32) {
    %c0_i32 = arith.constant 0 : i32
    %c0_i32_0 = arith.constant 0 : i32
    return %arg1, %c0_i32 : i32, i32
  }
  func.func @transform_3(%arg0: i32, %arg1: i32, %arg2: memref<2x16xi32, #tpu.memory_space<smem>>) -> (i32, i32) {
    %c0_i32 = arith.constant 0 : i32
    %c0_i32_0 = arith.constant 0 : i32
    %c0_i32_1 = arith.constant 0 : i32
    return %c0_i32, %c0_i32_0 : i32, i32
  }
  func.func @transform_4(%arg0: i32, %arg1: i32, %arg2: memref<2x16xi32, #tpu.memory_space<smem>>) -> (i32, i32) {
    %c0_i32 = arith.constant 0 : i32
    %c0_i32_0 = arith.constant 0 : i32
    %c0_i32_1 = arith.constant 0 : i32
    return %c0_i32, %c0_i32_0 : i32, i32
  }
  func.func @transform_5(%arg0: i32, %arg1: i32, %arg2: memref<2x16xi32, #tpu.memory_space<smem>>) -> (i32, i32) {
    %c0_i32 = arith.constant 0 : i32
    %c0_i32_0 = arith.constant 0 : i32
    %c0_i32_1 = arith.constant 0 : i32
    return %c0_i32, %c0_i32_0 : i32, i32
  }
  func.func @transform_6(%arg0: i32, %arg1: i32, %arg2: memref<2x16xi32, #tpu.memory_space<smem>>) -> (i32, i32, i32) {
    %c0_i32 = arith.constant 0 : i32
    %c0_i32_0 = arith.constant 0 : i32
    return %arg0, %arg1, %c0_i32 : i32, i32, i32
  }
}

</mosaic_0001>

<bundles_post_ra>
// kernel: tpu_custom_call.1
= control target key start
LH: loop header
LB: loop body
LE: loop exit
PB: predicated region body
PF: predicated region fallthrough
CT: control target
= control target key end

     0   :  { %s506_s27 = smov [#allocation5]   ;;  %s622_s0 = inlined_call_operand.hbm [shape: s32[2,16], index: 0, kind: input, shape index: {}]   ;;  %s623_s1 = inlined_call_operand.hbm [shape: f32[2,16], index: 1, kind: input, shape index: {}]   ;;  %s624_s2 = inlined_call_operand.hbm [shape: f32[32,128], index: 2, kind: input, shape index: {}]   ;;  %s625_s3 = inlined_call_operand.hbm [shape: f32[16,128], index: 3, kind: input, shape index: {}]   ;;  %s626_s4 = inlined_call_operand.vmem [shape: f32[1,128], index: 4, kind: input, shape index: {}]   ;;  %s627_s5 = inlined_call_operand.vmem [shape: f32[1,128], index: 5, kind: input, shape index: {}]   ;;  %s628_s6 = inlined_call_operand.vmem [shape: f32[1,128], index: 6, kind: input, shape index: {}]   ;;  %s629_s7 = inlined_call_operand.hbm [shape: f32[2,16,128], index: 7, kind: output, shape index: {}]  }
   0x1   :  { %s13_s26 = sshll.u32 %s622_s0, 4  ;;  %s14_s26 = int_to_ptr.hbm [resolvable:$true] %s13_s26 }
   0x2   :  { %16 = dma.hbm_to_smem %s14_s26, 32, %s506_s27, [#allocation4] }
   0x3   :  { %484 = dma.done.wait [#allocation4], 32 }
   0x4   :  { %485 = vsyncadd [#allocation4], 4294967264 }
   0x5   :  { %19 = sfence }
   0x6   :  { %20 = vsyncpa [#allocation7], 0 }
   0x7   :  { %21 = vsyncpa [#allocation10], 0 }
   0x8   :  { %22 = vsyncpa [#allocation8], 0  ;;  %s28_s30 = sshll.u32 %s623_s1, 4  ;;  %s507_s8 = smov [#allocation6]   ;;  %s29_s30 = int_to_ptr.hbm [resolvable:$true] %s28_s30 }
   0x9   :  { %s30_s9 = sshll.u32 %s507_s8, 4  ;;  %s38_s0 = sshll.u32 %s625_s3, 4  ;;  %s31_s9 = int_to_ptr.vmem [resolvable:$true] %s30_s9  ;;  %s39_s0 = int_to_ptr.hbm [resolvable:$true] %s38_s0 }
   0xa   :  { %33 = dma.hbm_to_vmem [thread:$0]  %s29_s30, 32, %s31_s9, [#allocation7]  }
   0xb   :  { %s508_s12 = smov [#allocation9]   ;;  %s509_s14 = smov 128  }
   0xc   :  { %s40_s13 = sshll.u32 %s508_s12, 4  ;;  %s510_s15 = smov 8   ;;  %s41_s13 = int_to_ptr.vmem [resolvable:$true] %s40_s13 }
   0xd   :  { %46 = dma.hbm_to_vmem [thread:$0]  %s39_s0, 256, %s41_s13, [#allocation10], %s509_s14, %s509_s14, %s510_s15  }
   0xe   :  { %486 = dma.done.wait [#allocation7], 32  }
   0xf   :  { %487 = vsyncadd [#allocation7], 4294967264 }
  0x10   :  { %488 = dma.done.wait [#allocation10], 256  }
  0x11   :  { %489 = vsyncadd [#allocation10], 4294967040  ;;  %s565_s1 = smov 0  }
  0x12 LB: > { %s309_s3 = sshll.u32 %s496_s1, 4  ;;  %s571_s16 = smov 0   ;;  %s496_s1 = sphi %s565_s1, %s68_s1  }
  0x13 LB: >> { %s78_s17 = sshra.s32 %s500_s16, 7  ;;  %s83_s18 = sand.u32 127, %s500_s16  ;;  %s500_s16 = sphi %s571_s16, %s76_s16  }
  0x14   : >> { %s80_s19 = sadd.s32 %s496_s1, %s78_s17  ;;  %s90_s23 = sadd.s32 %s500_s16, %s309_s3 }
  0x15   : >> { %s310_s20 = sshll.u32 %s80_s19, 7  ;;  %s92_s24 = scalar_lea.vmem [#allocation2], %s90_s23 }
  0x16   : >> { %s84_s21 = sadd.s32 %s310_s20, %s83_s18  ;;  %s102_s25 = sshll.u32 %s92_s24, 4  ;;  %s103_s25 = int_to_ptr.vmem [resolvable:$true] %s102_s25 }
  0x17   : >> { %s85_s22 = sld [smem:[#allocation5 + %s84_s21]]  ;;  %s428_s11 = scalar_lea.hbm %s624_s2, 32 }
  0x1d   : >> { %p86_p0 = scmp.gt.s32.totalorder %s85_s22, 0  ;;  %p311_p1 = scmp.lt.s32.totalorder %s85_s22, 31 }
  0x1f   : >> { %s631_s22 = smov (!%p86_p0, %s85_s22), 0 }
  0x20   : >> { %s633_s22 = smov (!%p311_p1, %s631_s22), 31 }
  0x21   : >> { %s91_s28 = scalar_lea.hbm %s624_s2, %s633_s22 }
  0x22   : >> { %s100_s29 = sshll.u32 %s91_s28, 4  ;;  %s101_s29 = int_to_ptr.hbm [resolvable:$true] %s100_s29 }
  0x23   : >> { %s424_s30 = sshra.s32 %s101_s29, 4  ;;  %s425_s30 = int_to_ptr.hbm [resolvable:$true] %s424_s30 }
  0x24   : >> { %s426_s8 = scalar_lea.hbm %s425_s30, 1  ;;  %p429_p3 = scmp.lt.s32.totalorder %s425_s30, %s624_s2 }
  0x25   : >> { %p427_p2 = scmp.ne.s32.totalorder %s425_s30, %s426_s8  ;;  %p430_p4 = scmp.lt.s32.totalorder %s428_s11, %s426_s8 }
  0x27   : >> { %p431_p5 = por %p430_p4, %p429_p3 }
  0x29   : >> { %p432_p6 = pnand %p431_p5, %p427_p2 }
  0x2b   : >> { %435 = shalt.err (!%p432_p6)  }
  0x2c   : >> { %s436_s13 = sshra.s32 %s103_s25, 4  ;;  %s511_s18 = smov [#allocation2]   ;;  %s437_s13 = int_to_ptr.vmem [resolvable:$true] %s436_s13 }
  0x2d   : >> { %s438_s17 = scalar_lea.vmem %s437_s13, 1  ;;  %s440_s19 = scalar_lea.vmem %s511_s18, 32 }
  0x2e   : >> { %p439_p7 = scmp.ne.s32.totalorder %s437_s13, %s438_s17  ;;  %p441_p8 = scmp.lt.s32.totalorder %s437_s13, [#allocation2] }
  0x2f   : >> { %p442_p9 = scmp.lt.s32.totalorder %s440_s19, %s438_s17 }
  0x31   : >> { %p443_p10 = por %p442_p9, %p441_p8 }
  0x33   : >> { %p444_p11 = pnand %p443_p10, %p439_p7 }
  0x35   : >> { %447 = shalt.err (!%p444_p11)  }
  0x36   : >> { %105 = dma.hbm_to_vmem [thread:$0]  %s101_s29, 16, %s103_s25, [#allocation3] }
  0x37   : >> { %s76_s16 = sadd.s32 1, %s500_s16  }
  0x38   : >> { %p73_p12 = scmp.ge.s32.totalorder %s76_s16, 16  }
  0x39   : > { %s68_s1 = sadd.s32 (%p73_p12), 1, %s496_s1  }
  0x3a   : > { %75 = sbr.rel (!%p73_p12) target bundleno = 19 (0x13), region = 75  ;;  %p65_p13 = scmp.ge.s32.totalorder (%p73_p12), %s68_s1, 2  }
  0x3f   :  { %67 = sbr.rel (!%p65_p13) target bundleno = 18 (0x12), region = 86  ;;  %v110_v0 = vlaneseq (%p65_p13)  ;;  %v108_v2 = vld [vmem:[#allocation6] sm:$0x3] (%p65_p13)  ;;  %v106_v8 = vld [vmem:[#allocation9] sm:$0xff] (%p65_p13)  ;;  %v107_v15 = vld [vmem:[#allocation9 + $0x8] sm:$0xff] (%p65_p13)  ;;  %s502_s2 = smov (%p65_p13), 0  }
  0x40   :  { %v122_v3 = vperm.slane (%p65_p13), %v108_v2, 1  ;;  %v109_v4 = vperm.slane (%p65_p13), %v108_v2, 0  ;;  %v353_v6 = vld [vmem:[%s626_s4] ss:$0 sm:$0xff] (%p65_p13) }
  0x41   :  { %v111_v1 = vshrl.u32 (%p65_p13), %v110_v0, 7 }
  0x43   :  { %351 = vset.pattern.permute.xlu1 (%p65_p13), %v111_v1  ;;  %349 = vset.pattern.permute.xlu0 (%p65_p13), %v111_v1  ;;  %v118_v5 = vadd.s32 (%p65_p13), 8, %v111_v1 }
  0x4b   :  { %127 = vperm.xlu1 %351, %v122_v3   ;;  %114 = vperm.xlu0 %349, %v109_v4  }
  0x53   :  { %352 = vset.pattern.permute.xlu1 %v118_v5  ;;  %350 = vset.pattern.permute.xlu0 %v118_v5 }
  0x5b   :  { %133 = vperm.xlu1 %352, %v122_v3   ;;  %120 = vperm.xlu0 %350, %v109_v4  }
  0xbd   :  { %v128_v7 = vpop.permute.xlu1 %127  ;;  %v115_v9 = vpop.permute.xlu0 %114 }
  0xbe   :  { %v141_v10 = vmul.f32 %v353_v6, %v128_v7  ;;  %v139_v11 = vmul.f32 %v353_v6, %v115_v9 }
  0xc0   :  { %v145_v12 = vadd.f32 %v141_v10, %v106_v8  ;;  %v143_v13 = vadd.f32 %v139_v11, %v106_v8 }
  0xcd   :  { %v134_v14 = vpop.permute.xlu1 %133  ;;  %v121_v16 = vpop.permute.xlu0 %120 }
  0xce   :  { %v142_v17 = vmul.f32 %v353_v6, %v134_v14  ;;  %v140_v18 = vmul.f32 %v353_v6, %v121_v16 }
  0xd0   :  { %v146_v19 = vadd.f32 %v142_v17, %v107_v15  ;;  %v144_v20 = vadd.f32 %v140_v18, %v107_v15 }
  0xd1 LB: > { %490 = dma.done.wait [#allocation3], 16  ;;  %s504_s2 = sphi %s502_s2, %s152_s2  }
  0xd2   : > { %491 = vsyncadd [#allocation3], 4294967280  ;;  %s152_s2 = sadd.s32 1, %s504_s2  }
  0xd3   : > { %p149_p0 = scmp.ge.s32.totalorder %s152_s2, 32  }
  0xd4   :  { %v158_v21 = vld [vmem:[#allocation2 + $0x10] sm:$0xff] (%p149_p0)  ;;  %v156_v22 = vld [vmem:[#allocation2] sm:$0xff] (%p149_p0)  ;;  %v159_v25 = vld [vmem:[#allocation2 + $0x18] sm:$0xff] (%p149_p0)  ;;  %s270_s24 = sshll.u32 (%p149_p0), %s629_s7, 4  ;;  %s271_s24 = int_to_ptr.hbm [resolvable:$true] %s270_s24 }
  0xd5   :  { %151 = sbr.rel (!%p149_p0) target bundleno = 209 (0xd1), region = 97  ;;  %v162_v23 = vadd.f32 (%p149_p0), %v158_v21, %v145_v12  ;;  %v160_v24 = vadd.f32 (%p149_p0), %v156_v22, %v143_v13  ;;  %v157_v26 = vld [vmem:[#allocation2 + $0x8] sm:$0xff] (%p149_p0)  ;;  %v163_v27 = vadd.f32 (%p149_p0), %v159_v25, %v146_v19  ;;  %v354_v9 = vld [vmem:[%s627_s5] ss:$0 sm:$0xff] (%p149_p0)  ;;  %s512_s5 = smov (%p149_p0), [#allocation11]  }
  0xd6   :  { %v161_v28 = vadd.f32 (%p149_p0), %v157_v26, %v144_v20  ;;  %v355_v15 = vld [vmem:[%s628_s6] ss:$0 sm:$0xff] (%p149_p0)  ;;  %s268_s6 = sshll.u32 (%p149_p0), %s512_s5, 4  ;;  %s269_s6 = int_to_ptr.vmem [resolvable:$true] %s268_s6 }
  0xd7   :  { %168 = vadd.xlane.f32.xlu1 (%p149_p0), %v162_v23  ;;  %164 = vadd.xlane.f32.xlu0 (%p149_p0), %v160_v24 }
  0xdf   :  { %170 = vadd.xlane.f32.xlu1 %v163_v27  ;;  %166 = vadd.xlane.f32.xlu0 %v161_v28 }
 0x14a   :  { %v169_v29 = vpop.xlane.xlu1 %168  ;;  %v165_v30 = vpop.xlane.xlu0 %164 }
 0x14b   :  { %v174_v31 = vmul.f32 0.0078125, %v169_v29  ;;  %v172_v32 = vmul.f32 0.0078125, %v165_v30 }
 0x14d   :  { %v178_v33 = vsub.f32 %v162_v23, %v174_v31  ;;  %v176_v34 = vsub.f32 %v160_v24, %v172_v32 }
 0x14f   :  { %v182_v35 = vmul.f32 %v178_v33, %v178_v33  ;;  %v180_v36 = vmul.f32 %v176_v34, %v176_v34 }
 0x151   :  { %188 = vadd.xlane.f32.xlu0 %v182_v35  ;;  %184 = vadd.xlane.f32.xlu2 %v180_v36 }
 0x152   :  { %v171_v37 = vpop.xlane.xlu1 %170  ;;  %v167_v38 = vpop.xlane.xlu0 %166 }
 0x153   :  { %v175_v39 = vmul.f32 0.0078125, %v171_v37  ;;  %v173_v40 = vmul.f32 0.0078125, %v167_v38 }
 0x155   :  { %v600_v41 = vsub.f32 %v163_v27, %v175_v39  ;;  %v602_v42 = vsub.f32 %v161_v28, %v173_v40 }
 0x157   :  { %v183_v43 = vmul.f32 %v600_v41, %v600_v41  ;;  %v181_v44 = vmul.f32 %v602_v42, %v602_v42 }
 0x159   :  { %190 = vadd.xlane.f32.xlu1 %v183_v43  ;;  %186 = vadd.xlane.f32.xlu2 %v181_v44 }
 0x1c4   :  { %v185_v45 = vpop.xlane.xlu2 %184  ;;  %v189_v46 = vpop.xlane.xlu0 %188 }
 0x1c5   :  { %v192_v47 = vmul.f32 0.0078125, %v185_v45  ;;  %v194_v48 = vmul.f32 0.0078125, %v189_v46 }
 0x1c7   :  { %v196_v49 = vadd.f32 1e-12, %v192_v47  ;;  %v198_v50 = vadd.f32 1e-12, %v194_v48 }
 0x1c9   :  { %356 = vrsqrt.f32 %v196_v49  ;;  %vm206_vm2 = vweird.f32 %v196_v49  ;;  %vm226_vm4 = vweird.f32 %v198_v50 }
 0x1ca   :  { %358 = vrsqrt.f32 %v198_v50 }
 0x1cc   :  { %v191_v51 = vpop.xlane.xlu1 %190  ;;  %v187_v52 = vpop.xlane.xlu2 %186 }
 0x1cd   :  { %v195_v53 = vmul.f32 0.0078125, %v191_v51  ;;  %v193_v54 = vmul.f32 0.0078125, %v187_v52 }
 0x1cf   :  { %v357_v55 = vpop.eup %356  ;;  %v199_v56 = vadd.f32 1e-12, %v195_v53  ;;  %v197_v57 = vadd.f32 1e-12, %v193_v54 }
 0x1d0   :  { %v359_v58 = vpop.eup %358  ;;  %v201_v59 = vmul.f32 %v357_v55, %v196_v49  ;;  %vm207_vm0 = vweird.f32 %v357_v55 }
 0x1d1   :  { %v221_v60 = vmul.f32 %v359_v58, %v198_v50  ;;  %360 = vrsqrt.f32 %v199_v56  ;;  %vm227_vm1 = vweird.f32 %v359_v58  ;;  %vm208_vm3 = vmor %vm206_vm2, %vm207_vm0  ;;  %vm236_vm8 = vweird.f32 %v199_v56 }
 0x1d2   :  { %v202_v61 = vmul.f32 %v357_v55, %v201_v59  ;;  %362 = vrsqrt.f32 %v197_v57  ;;  %vm228_vm5 = vmor %vm226_vm4, %vm227_vm1  ;;  %vm216_vm10 = vweird.f32 %v197_v57 }
 0x1d3   :  { %v222_v62 = vmul.f32 %v359_v58, %v221_v60 }
 0x1d4   :  { %v203_v63 = vmul.f32 0.5, %v202_v61 }
 0x1d5   :  { %v223_v0 = vmul.f32 0.5, %v222_v62 }
 0x1d6   :  { %v204_v1 = vsub.f32 1.5, %v203_v63 }
 0x1d7   :  { %v361_v2 = vpop.eup %360  ;;  %v224_v3 = vsub.f32 1.5, %v223_v0 }
 0x1d8   :  { %v363_v4 = vpop.eup %362  ;;  %v205_v5 = vmul.f32 %v357_v55, %v204_v1  ;;  %v231_v6 = vmul.f32 %v361_v2, %v199_v56  ;;  %vm237_vm6 = vweird.f32 %v361_v2 }
 0x1d9   :  { %v225_v7 = vmul.f32 %v359_v58, %v224_v3  ;;  %v211_v8 = vmul.f32 %v363_v4, %v197_v57  ;;  %vm217_vm7 = vweird.f32 %v363_v4  ;;  %vm238_vm9 = vmor %vm236_vm8, %vm237_vm6 }
 0x1da   :  { %v209_v10 = vsel %vm208_vm3, %v357_v55, %v205_v5  ;;  %v232_v11 = vmul.f32 %v361_v2, %v231_v6  ;;  %vm218_vm11 = vmor %vm216_vm10, %vm217_vm7 }
 0x1db   :  { %v240_v12 = vmul.f32 %v209_v10, %v176_v34  ;;  %v229_v13 = vsel %vm228_vm5, %v359_v58, %v225_v7  ;;  %v212_v14 = vmul.f32 %v363_v4, %v211_v8 }
 0x1dc   :  { %v242_v16 = vmul.f32 %v229_v13, %v178_v33  ;;  %v233_v17 = vmul.f32 0.5, %v232_v11 }
 0x1dd   :  { %v213_v18 = vmul.f32 0.5, %v212_v14  ;;  %v248_v19 = vmul.f32 %v354_v9, %v240_v12 }
 0x1de   :  { %v234_v20 = vsub.f32 1.5, %v233_v17  ;;  %v250_v21 = vmul.f32 %v354_v9, %v242_v16 }
 0x1df   :  { %v214_v22 = vsub.f32 1.5, %v213_v18  ;;  %v256_v23 = vadd.f32 %v355_v15, %v248_v19 }
 0x1e0   :  { %v235_v24 = vmul.f32 %v361_v2, %v234_v20  ;;  %v258_v25 = vadd.f32 %v355_v15, %v250_v21 }
 0x1e1   :  { %v215_v26 = vmul.f32 %v363_v4, %v214_v22  ;;  %260 = vst [vmem:[#allocation11] sm:$0xff] %v256_v23 }
 0x1e2   :  { %v239_v27 = vsel %vm238_vm9, %v361_v2, %v235_v24  ;;  %262 = vst [vmem:[#allocation11 + $0x10] sm:$0xff] %v258_v25 }
 0x1e3   :  { %v243_v28 = vmul.f32 %v239_v27, %v600_v41  ;;  %v219_v29 = vsel %vm218_vm11, %v363_v4, %v215_v26 }
 0x1e4   :  { %v241_v30 = vmul.f32 %v219_v29, %v602_v42 }
 0x1e5   :  { %v251_v31 = vmul.f32 %v354_v9, %v243_v28 }
 0x1e6   :  { %v249_v32 = vmul.f32 %v354_v9, %v241_v30 }
 0x1e7   :  { %v259_v33 = vadd.f32 %v355_v15, %v251_v31 }
 0x1e8   :  { %v257_v34 = vadd.f32 %v355_v15, %v249_v32 }
 0x1e9   :  { %263 = vst [vmem:[#allocation11 + $0x18] sm:$0xff] %v259_v33 }
 0x1ea   :  { %261 = vst [vmem:[#allocation11 + $0x8] sm:$0xff] %v257_v34 }
 0x1eb   :  { %276 = dma.vmem_to_hbm [thread:$0]  %s269_s6, 512, %s271_s24, [#allocation8], %s509_s14, %s509_s14, %s510_s15  }
 0x1ec   :  { %492 = dma.done.wait [#allocation8], 512  }
 0x1ed   :  { %493 = vsyncadd [#allocation8], 4294966784 }
 0x1ee   :  { %281 = vsyncpa [#allocation7], 1 }
 0x1ef   :  { %282 = vsyncpa [#allocation10], 1 }
 0x1f0   :  { %283 = vsyncpa [#allocation8], 1 }
 0x1f1   :  { %284 = vsyncmov [#allocation3] }
 0x1f4   :  { %s285_s25 = vpop.sfrf %284 }
 0x1f5   :  { %p316_p1 = scmp.ne.s32.totalorder %s285_s25, 0 }
 0x1f7   :  { %289 = shalt.err (%p316_p1)  }

</bundles_post_ra>
